<compile_context>
chip_gen: v7x
topology: tpu7x:2x2x1
jax: 0.10.0
libtpu: 0.0.40
codegen_flags: <defaults>
</compile_context>

<pallas_src>
import functools

import jax
import jax.numpy as jnp
from jax.experimental import pallas as pl
from jax.experimental.pallas import tpu as pltpu


# ----------------------------------------------------------------------------
# Kernels
# ----------------------------------------------------------------------------

def _ln_rows_kernel(x_ref, g_ref, b_ref, o_ref, *, eps, n_feat):
    """Row-major path: block is (TB, F); features on the 128-lane axis."""
    x = x_ref[...].astype(jnp.float32)                      # (TB, F), one load
    mean = jnp.mean(x, axis=1, keepdims=True)               # (TB, 1)
    diff = x - mean
    # torch .std() is unbiased (divides by N-1); eps is added to std.
    var = jnp.sum(diff * diff, axis=1, keepdims=True) / (n_feat - 1)
    inv = pl.reciprocal(jnp.sqrt(var) + eps, approx=False)  # (TB, 1), per-row
    g = g_ref[...].astype(jnp.float32)                      # (1, F)
    b = b_ref[...].astype(jnp.float32)                      # (1, F)
    o_ref[...] = ((diff * inv) * g + b).astype(o_ref.dtype)


def _ln_lanes_kernel(xT_ref, g_ref, b_ref, oT_ref, *, eps, n_feat):
    """Lane-dense path for F < 128: block is (F, TB); batch on the lane axis."""
    x = xT_ref[...].astype(jnp.float32)                     # (F, TB), one load
    mean = jnp.mean(x, axis=0, keepdims=True)                # (1, TB)
    diff = x - mean
    var = jnp.sum(diff * diff, axis=0, keepdims=True) / (n_feat - 1)
    inv = pl.reciprocal(jnp.sqrt(var) + eps, approx=False)   # (1, TB), per-row
    g = g_ref[...].astype(jnp.float32)                       # (F, 1)
    b = b_ref[...].astype(jnp.float32)                       # (F, 1)
    oT_ref[...] = ((diff * inv) * g + b).astype(oT_ref.dtype)


# ----------------------------------------------------------------------------
# Tiling helpers
# ----------------------------------------------------------------------------

def _round_down(x, m):
    return (x // m) * m


def _row_tile(B, F, max_block_bytes):
    """Batch tile for the (TB, F) layout: TB multiple of 8 (sublanes) or == B."""
    tb = max(8, _round_down(max_block_bytes // (F * 4), 8))
    return B if tb >= B else tb


def _lane_tile(B, F, max_block_bytes):
    """Batch tile for the (F, TB) layout: TB multiple of 128 (lanes) or == B."""
    tb = max(128, _round_down(max_block_bytes // (F * 4), 128))
    return B if tb >= B else tb


# ----------------------------------------------------------------------------
# Wrapper
# ----------------------------------------------------------------------------

def layer_norm(x, gamma, beta, eps=1e-5, max_block_bytes=2 << 20):
    """x: (B, F) float array; gamma, beta: (F,)."""
    B, F = x.shape
    itemsize = x.dtype.itemsize

    cost = pl.CostEstimate(
        flops=8 * B * F,
        transcendentals=B,                                   # one sqrt/recip per row
        bytes_accessed=2 * B * F * itemsize + 2 * F * gamma.dtype.itemsize,
    )
    cparams = pltpu.CompilerParams(
        dimension_semantics=("parallel",),                   # blocks independent
        vmem_limit_bytes=32 * 1024 * 1024,                   # safe on v5e/v6e/v7x
    )

    if F < 128:
        # Lane-dense path: present (F, B) so batch rides the 128-lane axis.
        tb = _lane_tile(B, F, max_block_bytes)
        grid = (pl.cdiv(B, tb),)
        out_t = pl.pallas_call(
            functools.partial(_ln_lanes_kernel, eps=eps, n_feat=F),
            out_shape=jax.ShapeDtypeStruct((F, B), x.dtype),
            grid=grid,
            in_specs=[
                pl.BlockSpec((F, tb), lambda i: (0, i)),
                pl.BlockSpec((F, 1), lambda i: (0, 0)),      # VMEM-resident params
                pl.BlockSpec((F, 1), lambda i: (0, 0)),
            ],
            out_specs=pl.BlockSpec((F, tb), lambda i: (0, i)),
            compiler_params=cparams,
            cost_estimate=cost,
        )(x.T, gamma.reshape(F, 1), beta.reshape(F, 1))
        return out_t.T

    # Row-major path: (TB, F) blocks, features already lane-dense (F >= 128).
    tb = _row_tile(B, F, max_block_bytes)
    grid = (pl.cdiv(B, tb),)
    return pl.pallas_call(
        functools.partial(_ln_rows_kernel, eps=eps, n_feat=F),
        out_shape=jax.ShapeDtypeStruct((B, F), x.dtype),
        grid=grid,
        in_specs=[
            pl.BlockSpec((tb, F), lambda i: (i, 0)),
            pl.BlockSpec((1, F), lambda i: (0, 0)),          # VMEM-resident params
            pl.BlockSpec((1, F), lambda i: (0, 0)),
        ],
        out_specs=pl.BlockSpec((tb, F), lambda i: (i, 0)),
        compiler_params=cparams,
        cost_estimate=cost,
    )(x, gamma.reshape(1, F), beta.reshape(1, F))


# ----------------------------------------------------------------------------
# Pure-JAX reference (mirrors the PyTorch forward exactly)
# ----------------------------------------------------------------------------

def layer_norm_ref(x, gamma, beta, eps=1e-5):
    B = x.shape[0]
    xf = x.reshape(B, -1).astype(jnp.float32)
    mean = xf.mean(axis=1, keepdims=True)
    var = jnp.sum((xf - mean) ** 2, axis=1, keepdims=True) / (xf.shape[1] - 1)
    std = jnp.sqrt(var)
    y = (x.astype(jnp.float32) - mean) / (std + eps)
    return (gamma[None, :] * y + beta[None, :]).astype(x.dtype)


# ----------------------------------------------------------------------------
# Self-test
# ----------------------------------------------------------------------------

if __name__ == "__main__":
    key = jax.random.PRNGKey(0)
    k_x, k_g, k_x2, k_g2, k_x3 = jax.random.split(key, 5)

    # Case 1: the ddpg_vec hidden-activation shape (F < 128 -> lane-dense path).
    batch, num_features = 8, 32
    x = jax.random.normal(k_x, (batch, num_features), dtype=jnp.float32)
    # Parameter init matching the module: gamma ~ Uniform(0, 1), beta = zeros.
    gamma = jax.random.uniform(k_g, (num_features,), dtype=jnp.float32)
    beta = jnp.zeros((num_features,), dtype=jnp.float32)

    out = jax.block_until_ready(layer_norm(x, gamma, beta))
    ref = layer_norm_ref(x, gamma, beta)
    assert jnp.allclose(out, ref, atol=1e-5, rtol=1e-5), "mismatch (lane path)"

    # Case 2: F >= 128 -> row-major path.
    b2, f2 = 24, 256
    x2 = jax.random.normal(k_x2, (b2, f2), dtype=jnp.float32)
    g2 = jax.random.uniform(k_g2, (f2,), dtype=jnp.float32)
    bt2 = jnp.zeros((f2,), dtype=jnp.float32)
    out2 = jax.block_until_ready(layer_norm(x2, g2, bt2))
    ref2 = layer_norm_ref(x2, g2, bt2)
    assert jnp.allclose(out2, ref2, atol=1e-5, rtol=1e-5), "mismatch (row path)"

    # Case 3: force multi-block grid (small max_block_bytes) incl. a partial
    # final block, to exercise the pipelined / padded-block code paths.
    b3, f3 = 52, 256
    x3 = jax.random.normal(k_x3, (b3, f3), dtype=jnp.float32)
    out3 = jax.block_until_ready(
        layer_norm(x3, g2, bt2, max_block_bytes=16 * 1024))
    ref3 = layer_norm_ref(x3, g2, bt2)
    assert jnp.allclose(out3, ref3, atol=1e-5, rtol=1e-5), "mismatch (tiled path)"

    print("KERNEL_OK")
</pallas_src>

<mosaic_0001>
module attributes {stable_mosaic.version = 11 : i64} {
  func.func @_ln_lanes_kernel(%arg0: i32, %arg1: memref<32x8xf32, #tpu.memory_space<vmem>>, %arg2: memref<32x1xf32, #tpu.memory_space<vmem>>, %arg3: memref<32x1xf32, #tpu.memory_space<vmem>>, %arg4: memref<32x8xf32, #tpu.memory_space<vmem>>) attributes {dimension_semantics = [#tpu.dimension_semantics<parallel>], iteration_bounds = array<i64: 1>, scalar_prefetch = 0 : i64, scratch_operands = 0 : i64, tpu.core_type = #tpu.core_type<tc>, window_params = [{transform_indices = @transform_0, window_bounds = array<i64: 32, 8>}, {pipeline_mode = #tpu.pipeline_mode<synchronous>, transform_indices = @transform_1, window_bounds = array<i64: 32, 1>}, {pipeline_mode = #tpu.pipeline_mode<synchronous>, transform_indices = @transform_2, window_bounds = array<i64: 32, 1>}, {transform_indices = @transform_3, window_bounds = array<i64: 32, 8>}]} {
    %c0 = arith.constant 0 : index
    %c0_0 = arith.constant 0 : index
    %0 = vector.load %arg1[%c0, %c0_0] : memref<32x8xf32, #tpu.memory_space<vmem>>, vector<32x8xf32>
    %cst = arith.constant dense<0.000000e+00> : vector<8xf32>
    %1 = vector.multi_reduction <add>, %0, %cst [0] : vector<32x8xf32> to vector<8xf32>
    %2 = vector.shape_cast %1 : vector<8xf32> to vector<1x8xf32>
    %cst_1 = arith.constant 3.200000e+01 : f32
    %3 = vector.broadcast %cst_1 : f32 to vector<1x8xf32>
    %4 = arith.divf %2, %3 : vector<1x8xf32>
    %5 = vector.broadcast %4 : vector<1x8xf32> to vector<32x8xf32>
    %6 = arith.subf %0, %5 : vector<32x8xf32>
    %7 = arith.mulf %6, %6 : vector<32x8xf32>
    %cst_2 = arith.constant dense<0.000000e+00> : vector<8xf32>
    %8 = vector.multi_reduction <add>, %7, %cst_2 [0] : vector<32x8xf32> to vector<8xf32>
    %9 = vector.shape_cast %8 : vector<8xf32> to vector<1x8xf32>
    %cst_3 = arith.constant 3.100000e+01 : f32
    %10 = vector.broadcast %cst_3 : f32 to vector<1x8xf32>
    %11 = arith.divf %9, %10 : vector<1x8xf32>
    %12 = math.sqrt %11 : vector<1x8xf32>
    %cst_4 = arith.constant 9.99999974E-6 : f32
    %13 = vector.broadcast %cst_4 : f32 to vector<1x8xf32>
    %14 = arith.addf %12, %13 : vector<1x8xf32>
    %15 = tpu.reciprocal %14 : vector<1x8xf32> -> vector<1x8xf32>
    %c0_5 = arith.constant 0 : index
    %c0_6 = arith.constant 0 : index
    %16 = vector.load %arg2[%c0_5, %c0_6] : memref<32x1xf32, #tpu.memory_space<vmem>>, vector<32x1xf32>
    %c0_7 = arith.constant 0 : index
    %c0_8 = arith.constant 0 : index
    %17 = vector.load %arg3[%c0_7, %c0_8] : memref<32x1xf32, #tpu.memory_space<vmem>>, vector<32x1xf32>
    %18 = vector.broadcast %15 : vector<1x8xf32> to vector<32x8xf32>
    %19 = arith.mulf %6, %18 : vector<32x8xf32>
    %20 = vector.broadcast %16 : vector<32x1xf32> to vector<32x8xf32>
    %21 = arith.mulf %19, %20 : vector<32x8xf32>
    %22 = vector.broadcast %17 : vector<32x1xf32> to vector<32x8xf32>
    %23 = arith.addf %21, %22 : vector<32x8xf32>
    %c0_9 = arith.constant 0 : index
    %c0_10 = arith.constant 0 : index
    %24 = vector.load %arg4[%c0_9, %c0_10] : memref<32x8xf32, #tpu.memory_space<vmem>>, vector<32x8xf32>
    tpu.vector_store %arg4[%c0_9, %c0_10], %23 {strides = array<i32>} : memref<32x8xf32, #tpu.memory_space<vmem>>, vector<32x8xf32>,
    return
  }
  func.func @transform_0(%arg0: i32) -> (i32, i32) {
    %c0_i32 = arith.constant 0 : i32
    %c0_i32_0 = arith.constant 0 : i32
    return %c0_i32, %arg0 : i32, i32
  }
  func.func @transform_1(%arg0: i32) -> (i32, i32) {
    %c0_i32 = arith.constant 0 : i32
    %c0_i32_0 = arith.constant 0 : i32
    %c0_i32_1 = arith.constant 0 : i32
    return %c0_i32, %c0_i32_0 : i32, i32
  }
  func.func @transform_2(%arg0: i32) -> (i32, i32) {
    %c0_i32 = arith.constant 0 : i32
    %c0_i32_0 = arith.constant 0 : i32
    %c0_i32_1 = arith.constant 0 : i32
    return %c0_i32, %c0_i32_0 : i32, i32
  }
  func.func @transform_3(%arg0: i32) -> (i32, i32) {
    %c0_i32 = arith.constant 0 : i32
    %c0_i32_0 = arith.constant 0 : i32
    return %c0_i32, %arg0 : i32, i32
  }
}

</mosaic_0001>

<bundles_post_ra>
// kernel: tpu_custom_call.1
= control target key start
LH: loop header
LB: loop body
LE: loop exit
PB: predicated region body
PF: predicated region fallthrough
CT: control target
= control target key end

     0   :  { %v141_v0 = vmov 0   ;;  %vm18_vm0 = vcmask 64512   ;;  %s222_s1 = inlined_call_operand.vmem [shape: f32[32,1], index: 1, kind: input, shape index: {}]   ;;  %s223_s0 = inlined_call_operand.vmem [shape: f32[32,8], index: 0, kind: input, shape index: {}]   ;;  %s224_s2 = inlined_call_operand.vmem [shape: f32[32,1], index: 2, kind: input, shape index: {}]   ;;  %s225_s3 = inlined_call_operand.vmem [shape: f32[32,8], index: 3, kind: output, shape index: {}]  }
   0x1   :  { %136 = vset.pattern.permute.xlu1 %v141_v0  ;;  %135 = vset.pattern.permute.xlu0 %v141_v0  ;;  %v68_v1 = vld [vmem:[%s222_s1 + $0x10] sm:$0xff]  ;;  %v66_v2 = vld [vmem:[%s222_s1] sm:$0xff]  ;;  %v69_v3 = vld [vmem:[%s222_s1 + $0x18] sm:$0xff] }
   0x2   :  { %90 = vperm.xlu1 %136, %v68_v1   ;;  %80 = vperm.xlu0 %135, %v66_v2   ;;  %v67_v4 = vld [vmem:[%s222_s1 + $0x8] sm:$0xff]  ;;  %v14_v5 = vld [vmem:[%s223_s0] sm:$0xff]  ;;  %v16_v7 = vld [vmem:[%s223_s0 + $0x10] sm:$0xff] }
   0x3   :  { %v15_v6 = vld [vmem:[%s223_s0 + $0x8] sm:$0xff]  ;;  %v17_v8 = vld [vmem:[%s223_s0 + $0x18] sm:$0xff]  ;;  %v19_v9 = vsel %vm18_vm0, %v14_v5, 0.0  ;;  %v22_v11 = vsel %vm18_vm0, %v16_v7, 0.0  ;;  %v70_v14 = vld [vmem:[%s224_s2] sm:$0xff] }
   0x4   :  { %v20_v10 = vsel %vm18_vm0, %v15_v6, 0.0  ;;  %v71_v13 = vld [vmem:[%s224_s2 + $0x8] sm:$0xff]  ;;  %v24_v15 = vsel %vm18_vm0, %v17_v8, 0.0  ;;  %v73_v18 = vld [vmem:[%s224_s2 + $0x18] sm:$0xff]  ;;  %v72_v19 = vld [vmem:[%s224_s2 + $0x10] sm:$0xff] }
   0x5   :  { %v21_v12 = vadd.f32 %v20_v10, %v19_v9 }
   0x6   :  { %95 = vperm.xlu1 %136, %v69_v3   ;;  %85 = vperm.xlu0 %135, %v67_v4  }
   0x7   :  { %v23_v16 = vadd.f32 %v22_v11, %v21_v12 }
   0x9   :  { %v25_v17 = vadd.f32 %v24_v15, %v23_v16 }
   0xa   :  { %109 = vperm.xlu1 %136, %v71_v13   ;;  %104 = vperm.xlu0 %135, %v70_v14  }
   0xb   :  { %v26_v20 = vrot.slane %v25_v17, 4 }
   0xd   :  { %v27_v21 = vadd.f32 %v26_v20, %v25_v17 }
   0xe   :  { %119 = vperm.xlu1 %136, %v73_v18   ;;  %114 = vperm.xlu0 %135, %v72_v19  }
   0xf   :  { %v28_v22 = vrot.slane %v27_v21, 2 }
  0x11   :  { %v29_v23 = vadd.f32 %v28_v22, %v27_v21 }
  0x13   :  { %v30_v24 = vrot.slane %v29_v23, 1 }
  0x15   :  { %v31_v25 = vadd.f32 %v30_v24, %v29_v23 }
  0x17   :  { %v33_v26 = vmul.f32 0.03125, %v31_v25 }
  0x19   :  { %v34_v27 = vsub.f32 %v14_v5, %v33_v26  ;;  %v35_v28 = vsub.f32 %v15_v6, %v33_v26  ;;  %v36_v29 = vsub.f32 %v16_v7, %v33_v26  ;;  %v37_v32 = vsub.f32 %v17_v8, %v33_v26 }
  0x1b   :  { %v38_v30 = vmul.f32 %v34_v27, %v34_v27  ;;  %v39_v31 = vmul.f32 %v35_v28, %v35_v28  ;;  %v40_v33 = vmul.f32 %v36_v29, %v36_v29  ;;  %v41_v37 = vmul.f32 %v37_v32, %v37_v32 }
  0x1d   :  { %v42_v34 = vsel %vm18_vm0, %v38_v30, 0.0  ;;  %v43_v35 = vsel %vm18_vm0, %v39_v31, 0.0  ;;  %v45_v38 = vsel %vm18_vm0, %v40_v33, 0.0  ;;  %v47_v40 = vsel %vm18_vm0, %v41_v37, 0.0 }
  0x1e   :  { %v44_v36 = vadd.f32 %v43_v35, %v42_v34 }
  0x20   :  { %v46_v39 = vadd.f32 %v45_v38, %v44_v36 }
  0x22   :  { %v48_v41 = vadd.f32 %v47_v40, %v46_v39 }
  0x24   :  { %v49_v42 = vrot.slane %v48_v41, 4 }
  0x26   :  { %v50_v43 = vadd.f32 %v49_v42, %v48_v41 }
  0x28   :  { %v51_v44 = vrot.slane %v50_v43, 2 }
  0x2a   :  { %v52_v45 = vadd.f32 %v51_v44, %v50_v43 }
  0x2c   :  { %v53_v46 = vrot.slane %v52_v45, 1 }
  0x2e   :  { %v54_v47 = vadd.f32 %v53_v46, %v52_v45 }
  0x30   :  { %v56_v48 = vmul.f32 0.032258064, %v54_v47 }
  0x32   :  { %137 = vrsqrt.f32 %v56_v48  ;;  %vm59_vm1 = vcmp.eq.f32.partialorder %v56_v48, inf  ;;  %v62_v51 = vand.u32 2147483648, %v56_v48  ;;  %vm61_vm2 = vcmp.eq.f32.partialorder %v56_v48, 0.0 }
  0x3c   :  { %v138_v49 = vpop.eup %137 }
  0x3d   :  { %v58_v50 = vmul.f32 %v138_v49, %v56_v48 }
  0x3f   :  { %v60_v52 = vsel %vm59_vm1, %v56_v48, %v58_v50 }
  0x40   :  { %v63_v53 = vsel %vm61_vm2, %v62_v51, %v60_v52 }
  0x41   :  { %v64_v54 = vadd.f32 1e-05, %v63_v53 }
  0x43   :  { %139 = vrcp.f32 %v64_v54 }
  0x4d   :  { %v140_v55 = vpop.eup %139 }
  0x4e   :  { %v74_v58 = vmul.f32 %v140_v55, %v34_v27  ;;  %v75_v59 = vmul.f32 %v140_v55, %v35_v28  ;;  %v76_v62 = vmul.f32 %v140_v55, %v36_v29  ;;  %v77_v0 = vmul.f32 %v140_v55, %v37_v32 }
  0x81   :  { %v91_v56 = vpop.permute.xlu1 %90  ;;  %v81_v57 = vpop.permute.xlu0 %80 }
  0x82   :  { %v98_v63 = vmul.f32 %v81_v57, %v74_v58  ;;  %v100_v6 = vmul.f32 %v91_v56, %v76_v62 }
  0x85   :  { %v96_v60 = vpop.permute.xlu1 %95  ;;  %v86_v61 = vpop.permute.xlu0 %85 }
  0x86   :  { %v99_v1 = vmul.f32 %v86_v61, %v75_v59  ;;  %v101_v7 = vmul.f32 %v96_v60, %v77_v0 }
  0x89   :  { %v110_v2 = vpop.permute.xlu1 %109  ;;  %v105_v3 = vpop.permute.xlu0 %104 }
  0x8a   :  { %v123_v4 = vadd.f32 %v110_v2, %v99_v1  ;;  %v122_v5 = vadd.f32 %v105_v3, %v98_v63 }
  0x8c   :  { %127 = vst.msk [vmem:[%s225_s3 + $0x8] sm:$0xff] %vm18_vm0, %v123_v4  ;;  %126 = vst.msk [vmem:[%s225_s3] sm:$0xff] %vm18_vm0, %v122_v5 }
  0x8d   :  { %v120_v8 = vpop.permute.xlu1 %119  ;;  %v115_v9 = vpop.permute.xlu0 %114 }
  0x8e   :  { %v125_v10 = vadd.f32 %v120_v8, %v101_v7  ;;  %v124_v11 = vadd.f32 %v115_v9, %v100_v6 }
  0x90   :  { %129 = vst.msk [vmem:[%s225_s3 + $0x18] sm:$0xff] %vm18_vm0, %v125_v10  ;;  %128 = vst.msk [vmem:[%s225_s3 + $0x10] sm:$0xff] %vm18_vm0, %v124_v11 }

</bundles_post_ra>
